<compile_context>
chip_gen: v7x
topology: tpu7x:2x2x1
jax: 0.10.0
libtpu: 0.0.40
codegen_flags: <defaults>
</compile_context>

<pallas_src>
import functools

import jax
import jax.numpy as jnp
from jax.experimental import pallas as pl
from jax.experimental.pallas import tpu as pltpu


_INV_T = 2.0  # 1 / T, with T = 0.5 as in the PyTorch module.


def _nll_kernel(x1_ref, x2_ref, out_ref, rowsum_ref, diag_ref):
    """One (row-tile i, col-tile j) step over the BxB similarity matrix.

    x1_ref : (TM, D) rows of x1            (block i)
    x2_ref : (TN, D) rows of x2            (block j), TM == TN
    out_ref: (TM, 1) per-row -log(pos / (rowsum - pos)), written on the last j
    rowsum_ref, diag_ref : (TM, 1) f32 VMEM scratch (persist across j)
    """
    i = pl.program_id(0)
    j = pl.program_id(1)

    x1 = x1_ref[...]                                              # (TM, D)
    x2 = x2_ref[...]                                              # (TN, D)

    # Row-normalize; fold 1/T into the x1 scale so the matmul directly yields sim/T.
    # (Zero-norm rows produce inf/NaN, matching the PyTorch reference.)
    x1_scale = jax.lax.rsqrt(jnp.sum(x1 * x1, axis=1, keepdims=True)) * _INV_T
    x2_scale = jax.lax.rsqrt(jnp.sum(x2 * x2, axis=1, keepdims=True))
    x1n = x1 * x1_scale                                           # (TM, D)
    x2n = x2 * x2_scale                                           # (TN, D)

    @pl.when(j == 0)
    def _():
        rowsum_ref[...] = jnp.zeros_like(rowsum_ref)

    # Positive pairs live on the global diagonal -> only inside the j == i tile.
    # Row-wise dot, O(TM*D); no BxB mask / iota needed.
    @pl.when(j == i)
    def _():
        diag_ref[...] = jnp.sum(x1n * x2n, axis=1, keepdims=True)  # = sim_ii / T

    # s[a, b] = <x1n_a, x2n_b> = sim / T.  MXU contraction, RHS transposed natively.
    s = jax.lax.dot_general(
        x1n, x2n,
        dimension_numbers=(((1,), (1,)), ((), ())),
        preferred_element_type=jnp.float32,
    )                                                              # (TM, TN)

    rowsum_ref[...] += jnp.sum(jnp.exp(s), axis=1, keepdims=True)

    @pl.when(j == pl.num_programs(1) - 1)
    def _():
        d = diag_ref[...]
        # -log(pos / (rowsum - pos)) = log(rowsum - exp(d)) - d
        out_ref[...] = jnp.log(rowsum_ref[...] - jnp.exp(d)) - d


def _pick_block(batch: int) -> int:
    for cand in (512, 256, 128):
        if batch % cand == 0:
            return cand
    # Small / non-divisible batches: run as a single tile.
    # TODO(synk): pad non-divisible large batches instead of falling back to one tile.
    return batch


@functools.partial(jax.jit, static_argnames=("block",))
def contrastive_loss(x1: jax.Array, x2: jax.Array, *, block: int | None = None) -> jax.Array:
    """Pallas-backed equivalent of ContrastiveLoss.forward(x1, x2)."""
    assert x1.shape == x2.shape and x1.ndim == 2
    batch, dim = x1.shape
    x1 = x1.astype(jnp.float32)
    x2 = x2.astype(jnp.float32)

    if block is None:
        block = _pick_block(batch)
    assert batch % block == 0, "batch must be divisible by the tile size"
    nb = batch // block

    per_row_nll = pl.pallas_call(
        _nll_kernel,
        out_shape=jax.ShapeDtypeStruct((batch, 1), jnp.float32),
        grid_spec=pltpu.PrefetchScalarGridSpec(
            num_scalar_prefetch=0,
            grid=(nb, nb),                                   # (row tiles, col tiles=reduction)
            in_specs=[
                pl.BlockSpec((block, dim), lambda i, j: (i, 0)),   # x1 rows for this row tile
                pl.BlockSpec((block, dim), lambda i, j: (j, 0)),   # x2 rows for this col tile
            ],
            out_specs=pl.BlockSpec((block, 1), lambda i, j: (i, 0)),
            scratch_shapes=[
                pltpu.VMEM((block, 1), jnp.float32),         # rowsum accumulator
                pltpu.VMEM((block, 1), jnp.float32),         # diag (pos) term
            ],
        ),
        compiler_params=pltpu.CompilerParams(
            dimension_semantics=("parallel", "arbitrary"),
        ),
    )(x1, x2)

    # Tiny final reduction (B scalars) done in XLA.
    return jnp.mean(per_row_nll)


def _reference_loss(x1, x2):
    """Pure-JAX mirror of the PyTorch forward, for validation."""
    T = 0.5
    x1_abs = jnp.linalg.norm(x1, axis=1)
    x2_abs = jnp.linalg.norm(x2, axis=1)
    sim = jnp.einsum("ik,jk->ij", x1, x2) / jnp.einsum("i,j->ij", x1_abs, x2_abs)
    sim = jnp.exp(sim / T)
    pos = jnp.diag(sim)
    loss = pos / (sim.sum(axis=1) - pos)
    return -jnp.mean(jnp.log(loss))


if __name__ == "__main__":
    key = jax.random.PRNGKey(0)

    # Small case (matches the module's simple (batch, hidden) interface): single tile.
    k1, k2, k3, k4 = jax.random.split(key, 4)
    x1_small = jax.random.normal(k1, (8, 32), dtype=jnp.float32)
    x2_small = jax.random.normal(k2, (8, 32), dtype=jnp.float32)
    loss_small = contrastive_loss(x1_small, x2_small)
    jax.block_until_ready(loss_small)
    ref_small = _reference_loss(x1_small, x2_small)
    assert jnp.allclose(loss_small, ref_small, rtol=1e-4, atol=1e-5), (loss_small, ref_small)

    # Larger case to exercise the tiled grid (2x2 tiles of 128) and accumulators.
    x1_big = jax.random.normal(k3, (256, 128), dtype=jnp.float32)
    x2_big = jax.random.normal(k4, (256, 128), dtype=jnp.float32)
    loss_big = contrastive_loss(x1_big, x2_big)
    jax.block_until_ready(loss_big)
    ref_big = _reference_loss(x1_big, x2_big)
    assert jnp.allclose(loss_big, ref_big, rtol=1e-4, atol=1e-5), (loss_big, ref_big)

    print("KERNEL_OK")
</pallas_src>

<mosaic_0001>
module attributes {stable_mosaic.version = 11 : i64} {
  func.func @_nll_kernel(%arg0: i32, %arg1: i32, %arg2: memref<8x32xf32, #tpu.memory_space<vmem>>, %arg3: memref<8x32xf32, #tpu.memory_space<vmem>>, %arg4: memref<8x1xf32, #tpu.memory_space<vmem>>, %arg5: memref<8x1xf32, #tpu.memory_space<vmem>>, %arg6: memref<8x1xf32, #tpu.memory_space<vmem>>) attributes {dimension_semantics = [#tpu.dimension_semantics<parallel>, #tpu.dimension_semantics<arbitrary>], iteration_bounds = array<i64: 1, 1>, scalar_prefetch = 0 : i64, scratch_operands = 2 : i64, tpu.core_type = #tpu.core_type<tc>, window_params = [{transform_indices = @transform_0, window_bounds = array<i64: 8, 32>}, {transform_indices = @transform_1, window_bounds = array<i64: 8, 32>}, {transform_indices = @transform_2, window_bounds = array<i64: 8, 1>}]} {
    %c0 = arith.constant 0 : index
    %c0_0 = arith.constant 0 : index
    %0 = vector.load %arg2[%c0, %c0_0] : memref<8x32xf32, #tpu.memory_space<vmem>>, vector<8x32xf32>
    %c0_1 = arith.constant 0 : index
    %c0_2 = arith.constant 0 : index
    %1 = vector.load %arg3[%c0_1, %c0_2] : memref<8x32xf32, #tpu.memory_space<vmem>>, vector<8x32xf32>
    %2 = arith.mulf %0, %0 : vector<8x32xf32>
    %cst = arith.constant dense<0.000000e+00> : vector<8xf32>
    %3 = vector.multi_reduction <add>, %2, %cst [1] : vector<8x32xf32> to vector<8xf32>
    %4 = vector.shape_cast %3 : vector<8xf32> to vector<8x1xf32>
    %5 = math.rsqrt %4 : vector<8x1xf32>
    %cst_3 = arith.constant 2.000000e+00 : f32
    %6 = vector.broadcast %cst_3 : f32 to vector<8x1xf32>
    %7 = arith.mulf %5, %6 : vector<8x1xf32>
    %8 = arith.mulf %1, %1 : vector<8x32xf32>
    %cst_4 = arith.constant dense<0.000000e+00> : vector<8xf32>
    %9 = vector.multi_reduction <add>, %8, %cst_4 [1] : vector<8x32xf32> to vector<8xf32>
    %10 = vector.shape_cast %9 : vector<8xf32> to vector<8x1xf32>
    %11 = math.rsqrt %10 : vector<8x1xf32>
    %12 = vector.broadcast %7 : vector<8x1xf32> to vector<8x32xf32>
    %13 = arith.mulf %0, %12 : vector<8x32xf32>
    %14 = vector.broadcast %11 : vector<8x1xf32> to vector<8x32xf32>
    %15 = arith.mulf %1, %14 : vector<8x32xf32>
    %c0_i32 = arith.constant 0 : i32
    %16 = arith.cmpi eq, %arg1, %c0_i32 : i32
    %17 = arith.extui %16 : i1 to i32
    %c0_i32_5 = arith.constant 0 : i32
    %18 = arith.cmpi ne, %17, %c0_i32_5 : i32
    scf.if %18 {
      %cst_15 = arith.constant 0.000000e+00 : f32
      %32 = vector.broadcast %cst_15 : f32 to vector<8x1xf32>
      %c0_16 = arith.constant 0 : index
      %c0_17 = arith.constant 0 : index
      %33 = vector.load %arg5[%c0_16, %c0_17] : memref<8x1xf32, #tpu.memory_space<vmem>>, vector<8x1xf32>
      tpu.vector_store %arg5[%c0_16, %c0_17], %32 {strides = array<i32>} : memref<8x1xf32, #tpu.memory_space<vmem>>, vector<8x1xf32>,
    } else {
    }
    %19 = arith.cmpi eq, %arg1, %arg0 : i32
    %20 = arith.extui %19 : i1 to i32
    %c0_i32_6 = arith.constant 0 : i32
    %21 = arith.cmpi ne, %20, %c0_i32_6 : i32
    scf.if %21 {
      %32 = arith.mulf %13, %15 : vector<8x32xf32>
      %cst_15 = arith.constant dense<0.000000e+00> : vector<8xf32>
      %33 = vector.multi_reduction <add>, %32, %cst_15 [1] : vector<8x32xf32> to vector<8xf32>
      %34 = vector.shape_cast %33 : vector<8xf32> to vector<8x1xf32>
      %c0_16 = arith.constant 0 : index
      %c0_17 = arith.constant 0 : index
      %35 = vector.load %arg6[%c0_16, %c0_17] : memref<8x1xf32, #tpu.memory_space<vmem>>, vector<8x1xf32>
      tpu.vector_store %arg6[%c0_16, %c0_17], %34 {strides = array<i32>} : memref<8x1xf32, #tpu.memory_space<vmem>>, vector<8x1xf32>,
    } else {
    }
    %cst_7 = arith.constant dense<0.000000e+00> : vector<8x8xf32>
    %22 = tpu.matmul %13, %15, %cst_7 {dimension_numbers = #tpu.dot_dimension_numbers<[1], [1], [0], [0], [0, 0, 1, 0], [], []>} : vector<8x32xf32>, vector<8x32xf32>, vector<8x8xf32> -> vector<8x8xf32>
    %c0_8 = arith.constant 0 : index
    %c0_9 = arith.constant 0 : index
    %23 = vector.load %arg5[%c0_8, %c0_9] : memref<8x1xf32, #tpu.memory_space<vmem>>, vector<8x1xf32>
    %24 = math.exp %22 : vector<8x8xf32>
    %cst_10 = arith.constant dense<0.000000e+00> : vector<8xf32>
    %25 = vector.multi_reduction <add>, %24, %cst_10 [1] : vector<8x8xf32> to vector<8xf32>
    %26 = vector.shape_cast %25 : vector<8xf32> to vector<8x1xf32>
    %27 = arith.addf %23, %26 : vector<8x1xf32>
    %c0_11 = arith.constant 0 : index
    %c0_12 = arith.constant 0 : index
    %28 = vector.load %arg5[%c0_11, %c0_12] : memref<8x1xf32, #tpu.memory_space<vmem>>, vector<8x1xf32>
    tpu.vector_store %arg5[%c0_11, %c0_12], %27 {strides = array<i32>} : memref<8x1xf32, #tpu.memory_space<vmem>>, vector<8x1xf32>,
    %c0_i32_13 = arith.constant 0 : i32
    %29 = arith.cmpi eq, %arg1, %c0_i32_13 : i32
    %30 = arith.extui %29 : i1 to i32
    %c0_i32_14 = arith.constant 0 : i32
    %31 = arith.cmpi ne, %30, %c0_i32_14 : i32
    scf.if %31 {
      %c0_15 = arith.constant 0 : index
      %c0_16 = arith.constant 0 : index
      %32 = vector.load %arg6[%c0_15, %c0_16] : memref<8x1xf32, #tpu.memory_space<vmem>>, vector<8x1xf32>
      %c0_17 = arith.constant 0 : index
      %c0_18 = arith.constant 0 : index
      %33 = vector.load %arg5[%c0_17, %c0_18] : memref<8x1xf32, #tpu.memory_space<vmem>>, vector<8x1xf32>
      %34 = math.exp %32 : vector<8x1xf32>
      %35 = arith.subf %33, %34 : vector<8x1xf32>
      %36 = math.log %35 : vector<8x1xf32>
      %37 = arith.subf %36, %32 : vector<8x1xf32>
      %c0_19 = arith.constant 0 : index
      %c0_20 = arith.constant 0 : index
      %38 = vector.load %arg4[%c0_19, %c0_20] : memref<8x1xf32, #tpu.memory_space<vmem>>, vector<8x1xf32>
      tpu.vector_store %arg4[%c0_19, %c0_20], %37 {strides = array<i32>} : memref<8x1xf32, #tpu.memory_space<vmem>>, vector<8x1xf32>,
    } else {
    }
    return
  }
  func.func @transform_0(%arg0: i32, %arg1: i32) -> (i32, i32) {
    %c0_i32 = arith.constant 0 : i32
    %c0_i32_0 = arith.constant 0 : i32
    return %arg0, %c0_i32 : i32, i32
  }
  func.func @transform_1(%arg0: i32, %arg1: i32) -> (i32, i32) {
    %c0_i32 = arith.constant 0 : i32
    %c0_i32_0 = arith.constant 0 : i32
    return %arg1, %c0_i32 : i32, i32
  }
  func.func @transform_2(%arg0: i32, %arg1: i32) -> (i32, i32) {
    %c0_i32 = arith.constant 0 : i32
    %c0_i32_0 = arith.constant 0 : i32
    return %arg0, %c0_i32 : i32, i32
  }
}

</mosaic_0001>

<bundles_post_ra>
// kernel: contrastive_loss.1
= control target key start
LH: loop header
LB: loop body
LE: loop exit
PB: predicated region body
PF: predicated region fallthrough
CT: control target
= control target key end

     0   :  { %7 = vsyncpa [#allocation5], 0  ;;  %s297_s0 = inlined_call_operand.hbm [shape: f32[8,32], index: 0, kind: input, shape index: {}]   ;;  %s298_s1 = inlined_call_operand.hbm [shape: f32[8,32], index: 1, kind: input, shape index: {}]   ;;  %s299_s2 = inlined_call_operand.vmem [shape: f32[8,1], index: 2, kind: output, shape index: {}]  }
   0x1   :  { %8 = vsyncpa [#allocation7], 0  ;;  %s242_s9 = smov [#allocation4]   ;;  %s243_s11 = smov [#allocation6]  }
   0x2   :  { %s15_s10 = sshll.u32 %s242_s9, 4  ;;  %s25_s12 = sshll.u32 %s243_s11, 4  ;;  %s16_s10 = int_to_ptr.vmem [resolvable:$true] %s15_s10  ;;  %s26_s12 = int_to_ptr.vmem [resolvable:$true] %s25_s12 }
   0x3   :  { %s194_s15 = scalar_lea.hbm %s297_s0, 128 }
   0x4   :  { %p195_p0 = scmp.ne.s32.totalorder %s297_s0, %s194_s15  ;;  %p198_p1 = scmp.lt.u32.totalorder %s194_s15, %s297_s0 }
   0x6   :  { %p200_p2 = pnand %p198_p1, %p195_p0 }
   0x8   :  { %203 = shalt.err (!%p200_p2)
}
   0x9   :  { %s204_s20 = scalar_lea.vmem %s16_s10, 128  ;;  %p209_p4 = scmp.lt.s32.totalorder %s16_s10, %s16_s10 }
   0xa   :  { %p205_p3 = scmp.ne.s32.totalorder %s16_s10, %s204_s20  ;;  %p210_p5 = scmp.lt.s32.totalorder %s204_s20, %s204_s20 }
   0xc   :  { %p211_p6 = por %p210_p5, %p209_p4 }
   0xe   :  { %p212_p7 = pnand %p211_p6, %p205_p3 }
  0x10   :  { %215 = shalt.err (!%p212_p7)
}
  0x11   :  { %18 = dma.hbm_to_vmem [thread:$0]  %s297_s0, 128, %s16_s10, [#allocation5]  }
  0x12   :  { %s216_s25 = scalar_lea.hbm %s298_s1, 128 }
  0x13   :  { %p217_p8 = scmp.ne.s32.totalorder %s298_s1, %s216_s25  ;;  %p220_p9 = scmp.lt.u32.totalorder %s216_s25, %s298_s1 }
  0x15   :  { %p222_p10 = pnand %p220_p9, %p217_p8 }
  0x17   :  { %225 = shalt.err (!%p222_p10)
}
  0x18   :  { %s226_s30 = scalar_lea.vmem %s26_s12, 128  ;;  %p231_p12 = scmp.lt.s32.totalorder %s26_s12, %s26_s12 }
  0x19   :  { %p227_p11 = scmp.ne.s32.totalorder %s26_s12, %s226_s30  ;;  %p232_p13 = scmp.lt.s32.totalorder %s226_s30, %s226_s30 }
  0x1b   :  { %p233_p0 = por %p232_p13, %p231_p12 }
  0x1d   :  { %p234_p1 = pnand %p233_p0, %p227_p11 }
  0x1f   :  { %237 = shalt.err (!%p234_p1)
}
  0x20   :  { %28 = dma.hbm_to_vmem [thread:$0]  %s298_s1, 128, %s26_s12, [#allocation7]  }
  0x21   :  { %238 = dma.done.wait [#allocation5], 128  }
  0x22   :  { %239 = vsyncadd [#allocation5], 4294967168 }
  0x23   :  { %240 = dma.done.wait [#allocation7], 128  }
  0x24   :  { %241 = vsyncadd [#allocation7], 4294967168  ;;  %v36_v0 = vld [vmem:[#allocation6] sm:$0xff]  ;;  %vm38_vm0 = vcmask 261120   ;;  %v35_v1 = vld [vmem:[#allocation4] sm:$0xff]  ;;  %v244_v6 = vmov 0.0  }
  0x25   :  { %v44_v2 = vmul.f32 %v36_v0, %v36_v0  ;;  %v37_v3 = vmul.f32 %v35_v1, %v35_v1  ;;  %175 = vmatprep.subr.mxu0 %v244_v6  ;;  %vm55_vm1 = vcmask 7168   ;;  %vm245_vm2 = vmmov 0  }
  0x26   :  { %56 = vst.msk [vmem:[#allocation2] sm:$0xff] %vm55_vm1, %v244_v6  ;;  %177 = vmatprep.mubr.msk.f32.mxu0 %vm245_vm2, %v244_v6  ;;  %vm146_vm3 = vcmask 64512  }
  0x27   :  { %v45_v4 = vsel %vm38_vm0, %v44_v2, 0.0  ;;  %v39_v5 = vsel %vm38_vm0, %v37_v3, 0.0 }
  0x28   :  { %46 = vadd.xlane.f32.xlu0 %v45_v4 }
  0x2c   :  { %40 = vadd.xlane.f32.xlu0 %v39_v5 }
  0x2d   :  { %v143_v24 = vld [vmem:[#allocation2] sm:$0xff] }
  0xb5   :  { %v47_v7 = vpop.xlane.xlu0 %46 }
  0xb6   :  { %184 = vrsqrt.f32 %v47_v7 }
  0xb9   :  { %v41_v8 = vpop.xlane.xlu0 %40 }
  0xba   :  { %186 = vrsqrt.f32 %v41_v8 }
  0xc0   :  { %v185_v9 = vpop.eup %184 }
  0xc1   :  { %v50_v10 = vmul.f32 %v185_v9, %v36_v0 }
  0xc3   :  { %176 = vmatpush3.xpose.msk.msra.mxu0 %vm38_vm0, %v50_v10 }
  0xc4   :  { %v187_v11 = vpop.eup %186 }
  0xc5   :  { %v43_v12 = vmul.f32 2.0, %v187_v11 }
  0xc7   :  { %v49_v13 = vmul.f32 %v43_v12, %v35_v1 }
  0xc9   :  { %178 = vmatmul.mubr.msk.f32.vlgmr.msra.gmra.mrb[0].mxu0 %vm38_vm0, %v49_v13  ;;  %v61_v14 = vmul.f32 %v50_v10, %v49_v13 }
  0xcb   :  { %v62_v15 = vsel %vm38_vm0, %v61_v14, 0.0 }
  0xcc   :  { %63 = vadd.xlane.f32.xlu1 %v62_v15 }
 0x159   :  { %v64_v16 = vpop.xlane.xlu1 %63 }
 0x15a   :  { %66 = vst.msk [vmem:[#allocation3] sm:$0xff] %vm55_vm1, %v64_v16 }
 0x161   :  { %v156_v22 = vld [vmem:[#allocation3] sm:$0xff] }
 0x162   :  { %v158_v23 = vmul.f32 1.442695, %v156_v22 }
 0x19c   :  { %v139_v17 = vpop.f32.mrb[0].mxu0 }
 0x19d   :  { %v144_v18 = vmul.f32 1.442695, %v139_v17  ;;  %v179_v19 = vpop.f32.mrb[1].mxu0 }
 0x19f   :  { %188 = vpow2.f32 %v144_v18 }
 0x1a0   :  { %190 = vpow2.f32 %v158_v23 }
 0x1a9   :  { %v189_v20 = vpop.eup %188 }
 0x1aa   :  { %v147_v21 = vsel %vm146_vm3, %v189_v20, 0.0  ;;  %v191_v27 = vpop.eup %190 }
 0x1ab   :  { %148 = vadd.xlane.f32.xlu1 %v147_v21 }
 0x238   :  { %v149_v25 = vpop.xlane.xlu1 %148 }
 0x239   :  { %v150_v26 = vadd.f32 %v149_v25, %v143_v24 }
 0x23b   :  { %152 = vst.msk [vmem:[#allocation2] sm:$0xff] %vm55_vm1, %v150_v26 }
 0x242   :  { %v157_v28 = vld [vmem:[#allocation2] sm:$0xff] }
 0x243   :  { %v160_v29 = vsub.f32 %v157_v28, %v191_v27 }
 0x245   :  { %192 = vlog2.f32 %v160_v29 }
 0x24f   :  { %v193_v30 = vpop.eup %192 }
 0x250   :  { %v162_v31 = vmul.f32 0.6931472, %v193_v30 }
 0x252   :  { %v163_v32 = vsub.f32 %v162_v31, %v156_v22 }
 0x254   :  { %164 = vst.msk [vmem:[%s299_s2] sm:$0xff] %vm55_vm1, %v163_v32 }
 0x255   :  { %169 = vsyncpa [#allocation5], 1 }
 0x256   :  { %170 = vsyncpa [#allocation7], 1 }

</bundles_post_ra>
